<compile_context>
chip_gen: v7x
topology: tpu7x:2x2x1
jax: 0.10.0
libtpu: 0.0.40
codegen_flags: <defaults>
</compile_context>

<pallas_src>
from functools import partial

import numpy as np
import jax
import jax.numpy as jnp
from jax.experimental import pallas as pl
from jax.experimental.pallas import tpu as pltpu


def _round_up(n, m):
    return ((n + m - 1) // m) * m


def _bf16_vpu_supported():
    """bf16 VPU exists on v6e (Trillium) and v7x; not on v2-v5."""
    try:
        kind = jax.devices()[0].device_kind.lower()
    except Exception:
        return False
    return any(tag in kind for tag in ("v6", "trillium", "v7"))


def _pick_batch_tile(B, block_b, target_steps):
    """Batch tile: multiple of 128 lanes, <= block_b, and small enough that
    the grid has >= target_steps steps when the batch allows it (megacore)."""
    b_pad = _round_up(B, 128)
    tb = _round_up(max(pl.cdiv(b_pad, target_steps), 128), 128)
    return min(tb, block_b, b_pad)


def actor_kernel(x_ref, w1_ref, b1_ref, w2_ref, b2_ref, w3_ref, b3_ref,
                 wh_ref, bh_ref, o_ref, *, act_dtype):
    # x tile arrives batch-major (TB, obs_dim) f32; the cast is VPU work and
    # the "transpose" happens on the MXU via an A @ B^T contraction, so the
    # batch sits on lanes for every layer after fc1.
    x_bf = x_ref[...].astype(jnp.bfloat16)                       # (TB, obs)

    # fc1: (64, obs) contracted with (TB, obs) over obs -> (64, TB), f32 acc.
    h = jax.lax.dot_general(
        w1_ref[...], x_bf,
        dimension_numbers=(((1,), (1,)), ((), ())),
        preferred_element_type=jnp.float32)
    h = jnp.maximum(h.astype(act_dtype) + b1_ref[...], 0.0)

    # fc2 / fc3: standard (64,64) @ (64,TB) matmuls, batch stays on lanes.
    h = jnp.dot(w2_ref[...], h.astype(jnp.bfloat16),
                preferred_element_type=jnp.float32)
    h = jnp.maximum(h.astype(act_dtype) + b2_ref[...], 0.0)

    h = jnp.dot(w3_ref[...], h.astype(jnp.bfloat16),
                preferred_element_type=jnp.float32)
    h = jnp.maximum(h.astype(act_dtype) + b3_ref[...], 0.0)

    # Fused heads: row 0 = action_out1 (tanh), row 1 = action_out2 (sigmoid).
    z = jnp.dot(wh_ref[...], h.astype(jnp.bfloat16),
                preferred_element_type=jnp.float32) + bh_ref[...]
    row = jax.lax.broadcasted_iota(jnp.int32, z.shape, 0)
    is_tanh = row == 0
    # Single EUP pass: tanh(z) = 2*sigmoid(2z) - 1.
    s = jax.nn.sigmoid(jnp.where(is_tanh, 2.0 * z, z))
    o_ref[...] = jnp.where(is_tanh, 2.0 * s - 1.0, s).astype(o_ref.dtype)


def actor_forward(x, params, *, block_b=4096, target_steps=4,
                  batch_major_output=True):
    """x: (B, obs_dim) float32.  Returns (B, 2) float32 actions
    (or (2, B) when batch_major_output=False, skipping the output transpose)."""
    w1, b1, w2, b2, w3, b3, wh, bh = params
    B, obs_dim = x.shape

    act_dtype = jnp.bfloat16 if _bf16_vpu_supported() else jnp.float32

    # One-time tiny param casts (weights bf16 for the MXU; biases in the
    # elementwise-epilogue dtype; head bias stays f32).
    w1b, w2b, w3b, whb = (w.astype(jnp.bfloat16) for w in (w1, w2, w3, wh))
    b1a, b2a, b3a = (b.astype(act_dtype) for b in (b1, b2, b3))
    bhf = bh.astype(jnp.float32)

    block_b = max(128, _round_up(block_b, 128))
    tb = _pick_batch_tile(B, block_b, target_steps)
    grid = (pl.cdiv(B, tb),)

    def const_spec(a):
        # Same block index every grid step -> weights stay resident in VMEM.
        return pl.BlockSpec(a.shape, lambda i: (0, 0))

    out_t = pl.pallas_call(
        partial(actor_kernel, act_dtype=act_dtype),
        out_shape=jax.ShapeDtypeStruct((2, B), jnp.float32),
        grid_spec=pltpu.PrefetchScalarGridSpec(
            num_scalar_prefetch=0,
            grid=grid,
            in_specs=[
                pl.BlockSpec((tb, obs_dim), lambda i: (i, 0)),   # x tile (natural layout)
                const_spec(w1b), const_spec(b1a),
                const_spec(w2b), const_spec(b2a),
                const_spec(w3b), const_spec(b3a),
                const_spec(whb), const_spec(bhf),
            ],
            out_specs=pl.BlockSpec((2, tb), lambda i: (0, i)),   # lane-dense stores
        ),
        compiler_params=pltpu.CompilerParams(
            dimension_semantics=("parallel",)),   # megacore split on v7x
    )(jnp.asarray(x, jnp.float32), w1b, b1a, w2b, b2a, w3b, b3a, whb, bhf)

    return out_t.T if batch_major_output else out_t


def init_params(key, obs_dim):
    """Deterministic synthetic params, PyTorch-native (out, in) layout."""
    ks = jax.random.split(key, 10)
    scale = 0.1
    w1 = scale * jax.random.normal(ks[0], (64, obs_dim), jnp.float32)
    b1 = scale * jax.random.normal(ks[1], (64, 1), jnp.float32)
    w2 = scale * jax.random.normal(ks[2], (64, 64), jnp.float32)
    b2 = scale * jax.random.normal(ks[3], (64, 1), jnp.float32)
    w3 = scale * jax.random.normal(ks[4], (64, 64), jnp.float32)
    b3 = scale * jax.random.normal(ks[5], (64, 1), jnp.float32)
    # Fused heads: row 0 = action_out1 (tanh), row 1 = action_out2 (sigmoid).
    wh1 = scale * jax.random.normal(ks[6], (1, 64), jnp.float32)
    bh1 = scale * jax.random.normal(ks[7], (1, 1), jnp.float32)
    wh2 = scale * jax.random.normal(ks[8], (1, 64), jnp.float32)
    bh2 = scale * jax.random.normal(ks[9], (1, 1), jnp.float32)
    wh = jnp.concatenate([wh1, wh2], axis=0)            # (2, 64)
    bh = jnp.concatenate([bh1, bh2], axis=0)            # (2, 1)
    return (w1, b1, w2, b2, w3, b3, wh, bh)


def actor_reference(x, params):
    """Plain-JAX f32 reference mirroring the PyTorch forward."""
    w1, b1, w2, b2, w3, b3, wh, bh = params
    h = jax.nn.relu(x @ w1.T + b1[:, 0])
    h = jax.nn.relu(h @ w2.T + b2[:, 0])
    h = jax.nn.relu(h @ w3.T + b3[:, 0])
    z = h @ wh.T + bh[:, 0]
    act1 = jnp.tanh(z[:, 0:1])
    act2 = jax.nn.sigmoid(z[:, 1:2])
    return jnp.concatenate([act1, act2], axis=-1)


if __name__ == "__main__":
    key = jax.random.PRNGKey(0)
    k_x, k_x2, k_p = jax.random.split(key, 3)

    B, OBS_DIM = 2, 24
    params = init_params(k_p, OBS_DIM)

    # Small batch (single partial tile; padded lanes masked on writeback).
    x = jax.random.normal(k_x, (B, OBS_DIM), jnp.float32)
    out = jax.block_until_ready(actor_forward(x, params))
    ref = actor_reference(x, params)
    # bf16 matmul operands / epilogue -> loosened tolerance vs pure-f32 ref.
    np.testing.assert_allclose(np.asarray(out), np.asarray(ref),
                               rtol=2e-2, atol=2e-2)

    # Multi-tile batch with a ragged last tile to exercise the grid/padding
    # path (tile picker keeps >= target_steps grid steps).
    B2 = 300
    x2 = jax.random.normal(k_x2, (B2, OBS_DIM), jnp.float32)
    out2 = jax.block_until_ready(actor_forward(x2, params))
    ref2 = actor_reference(x2, params)
    np.testing.assert_allclose(np.asarray(out2), np.asarray(ref2),
                               rtol=2e-2, atol=2e-2)

    # Lane-major output path (no trailing transpose) must match too.
    out3 = jax.block_until_ready(
        actor_forward(x2, params, batch_major_output=False))
    np.testing.assert_allclose(np.asarray(out3.T), np.asarray(ref2),
                               rtol=2e-2, atol=2e-2)

    print("KERNEL_OK")
</pallas_src>

<mosaic_0001>
module attributes {stable_mosaic.version = 11 : i64} {
  func.func @actor_kernel(%arg0: i32, %arg1: memref<128x24xf32, #tpu.memory_space<vmem>>, %arg2: memref<64x24xbf16, #tpu.memory_space<vmem>>, %arg3: memref<64x1xf32, #tpu.memory_space<vmem>>, %arg4: memref<64x64xbf16, #tpu.memory_space<vmem>>, %arg5: memref<64x1xf32, #tpu.memory_space<vmem>>, %arg6: memref<64x64xbf16, #tpu.memory_space<vmem>>, %arg7: memref<64x1xf32, #tpu.memory_space<vmem>>, %arg8: memref<2x64xbf16, #tpu.memory_space<vmem>>, %arg9: memref<2x1xf32, #tpu.memory_space<vmem>>, %arg10: memref<2x128xf32, #tpu.memory_space<vmem>>) attributes {dimension_semantics = [#tpu.dimension_semantics<parallel>], iteration_bounds = array<i64: 1>, scalar_prefetch = 0 : i64, scratch_operands = 0 : i64, tpu.core_type = #tpu.core_type<tc>, window_params = [{transform_indices = @transform_0, window_bounds = array<i64: 128, 24>}, {pipeline_mode = #tpu.pipeline_mode<synchronous>, transform_indices = @transform_1, window_bounds = array<i64: 64, 24>}, {pipeline_mode = #tpu.pipeline_mode<synchronous>, transform_indices = @transform_2, window_bounds = array<i64: 64, 1>}, {pipeline_mode = #tpu.pipeline_mode<synchronous>, transform_indices = @transform_3, window_bounds = array<i64: 64, 64>}, {pipeline_mode = #tpu.pipeline_mode<synchronous>, transform_indices = @transform_4, window_bounds = array<i64: 64, 1>}, {pipeline_mode = #tpu.pipeline_mode<synchronous>, transform_indices = @transform_5, window_bounds = array<i64: 64, 64>}, {pipeline_mode = #tpu.pipeline_mode<synchronous>, transform_indices = @transform_6, window_bounds = array<i64: 64, 1>}, {pipeline_mode = #tpu.pipeline_mode<synchronous>, transform_indices = @transform_7, window_bounds = array<i64: 2, 64>}, {pipeline_mode = #tpu.pipeline_mode<synchronous>, transform_indices = @transform_8, window_bounds = array<i64: 2, 1>}, {transform_indices = @transform_9, window_bounds = array<i64: 2, 128>}]} {
    %c0 = arith.constant 0 : index
    %c0_0 = arith.constant 0 : index
    %0 = vector.load %arg1[%c0, %c0_0] : memref<128x24xf32, #tpu.memory_space<vmem>>, vector<128x24xf32>
    %1 = arith.truncf %0 : vector<128x24xf32> to vector<128x24xbf16>
    %c0_1 = arith.constant 0 : index
    %c0_2 = arith.constant 0 : index
    %2 = vector.load %arg2[%c0_1, %c0_2] : memref<64x24xbf16, #tpu.memory_space<vmem>>, vector<64x24xbf16>
    %cst = arith.constant dense<0.000000e+00> : vector<64x128xf32>
    %3 = tpu.matmul %2, %1, %cst {dimension_numbers = #tpu.dot_dimension_numbers<[1], [1], [0], [0], [0, 0, 1, 0], [], []>} : vector<64x24xbf16>, vector<128x24xbf16>, vector<64x128xf32> -> vector<64x128xf32>
    %c0_3 = arith.constant 0 : index
    %c0_4 = arith.constant 0 : index
    %4 = vector.load %arg3[%c0_3, %c0_4] : memref<64x1xf32, #tpu.memory_space<vmem>>, vector<64x1xf32>
    %5 = vector.broadcast %4 : vector<64x1xf32> to vector<64x128xf32>
    %6 = arith.addf %3, %5 : vector<64x128xf32>
    %cst_5 = arith.constant 0.000000e+00 : f32
    %7 = vector.broadcast %cst_5 : f32 to vector<64x128xf32>
    %8 = arith.maximumf %6, %7 : vector<64x128xf32>
    %c0_6 = arith.constant 0 : index
    %c0_7 = arith.constant 0 : index
    %9 = vector.load %arg4[%c0_6, %c0_7] : memref<64x64xbf16, #tpu.memory_space<vmem>>, vector<64x64xbf16>
    %10 = arith.truncf %8 : vector<64x128xf32> to vector<64x128xbf16>
    %cst_8 = arith.constant dense<0.000000e+00> : vector<64x128xf32>
    %11 = tpu.matmul %9, %10, %cst_8 {dimension_numbers = #tpu.dot_dimension_numbers<[1], [0], [0], [1], [0, 0, 1, 1], [], []>} : vector<64x64xbf16>, vector<64x128xbf16>, vector<64x128xf32> -> vector<64x128xf32>
    %c0_9 = arith.constant 0 : index
    %c0_10 = arith.constant 0 : index
    %12 = vector.load %arg5[%c0_9, %c0_10] : memref<64x1xf32, #tpu.memory_space<vmem>>, vector<64x1xf32>
    %13 = vector.broadcast %12 : vector<64x1xf32> to vector<64x128xf32>
    %14 = arith.addf %11, %13 : vector<64x128xf32>
    %cst_11 = arith.constant 0.000000e+00 : f32
    %15 = vector.broadcast %cst_11 : f32 to vector<64x128xf32>
    %16 = arith.maximumf %14, %15 : vector<64x128xf32>
    %c0_12 = arith.constant 0 : index
    %c0_13 = arith.constant 0 : index
    %17 = vector.load %arg6[%c0_12, %c0_13] : memref<64x64xbf16, #tpu.memory_space<vmem>>, vector<64x64xbf16>
    %18 = arith.truncf %16 : vector<64x128xf32> to vector<64x128xbf16>
    %cst_14 = arith.constant dense<0.000000e+00> : vector<64x128xf32>
    %19 = tpu.matmul %17, %18, %cst_14 {dimension_numbers = #tpu.dot_dimension_numbers<[1], [0], [0], [1], [0, 0, 1, 1], [], []>} : vector<64x64xbf16>, vector<64x128xbf16>, vector<64x128xf32> -> vector<64x128xf32>
    %c0_15 = arith.constant 0 : index
    %c0_16 = arith.constant 0 : index
    %20 = vector.load %arg7[%c0_15, %c0_16] : memref<64x1xf32, #tpu.memory_space<vmem>>, vector<64x1xf32>
    %21 = vector.broadcast %20 : vector<64x1xf32> to vector<64x128xf32>
    %22 = arith.addf %19, %21 : vector<64x128xf32>
    %cst_17 = arith.constant 0.000000e+00 : f32
    %23 = vector.broadcast %cst_17 : f32 to vector<64x128xf32>
    %24 = arith.maximumf %22, %23 : vector<64x128xf32>
    %c0_18 = arith.constant 0 : index
    %c0_19 = arith.constant 0 : index
    %25 = vector.load %arg8[%c0_18, %c0_19] : memref<2x64xbf16, #tpu.memory_space<vmem>>, vector<2x64xbf16>
    %26 = arith.truncf %24 : vector<64x128xf32> to vector<64x128xbf16>
    %cst_20 = arith.constant dense<0.000000e+00> : vector<2x128xf32>
    %27 = tpu.matmul %25, %26, %cst_20 {dimension_numbers = #tpu.dot_dimension_numbers<[1], [0], [0], [1], [0, 0, 1, 1], [], []>} : vector<2x64xbf16>, vector<64x128xbf16>, vector<2x128xf32> -> vector<2x128xf32>
    %c0_21 = arith.constant 0 : index
    %c0_22 = arith.constant 0 : index
    %28 = vector.load %arg9[%c0_21, %c0_22] : memref<2x1xf32, #tpu.memory_space<vmem>>, vector<2x1xf32>
    %29 = vector.broadcast %28 : vector<2x1xf32> to vector<2x128xf32>
    %30 = arith.addf %27, %29 : vector<2x128xf32>
    %31 = tpu.iota {dimensions = array<i32: 0>} : vector<2x128xi32>
    %c0_i32 = arith.constant 0 : i32
    %32 = vector.broadcast %c0_i32 : i32 to vector<2x128xi32>
    %33 = arith.cmpi eq, %31, %32 : vector<2x128xi32>
    %cst_23 = arith.constant 2.000000e+00 : f32
    %34 = vector.broadcast %cst_23 : f32 to vector<2x128xf32>
    %35 = arith.mulf %34, %30 : vector<2x128xf32>
    %36 = arith.select %33, %35, %30 : vector<2x128xi1>, vector<2x128xf32>
    %37 = arith.negf %36 : vector<2x128xf32>
    %38 = math.exp %37 : vector<2x128xf32>
    %cst_24 = arith.constant 1.000000e+00 : f32
    %39 = vector.broadcast %cst_24 : f32 to vector<2x128xf32>
    %40 = arith.addf %39, %38 : vector<2x128xf32>
    %41 = arith.divf %39, %40 : vector<2x128xf32>
    %cst_25 = arith.constant 2.000000e+00 : f32
    %42 = vector.broadcast %cst_25 : f32 to vector<2x128xf32>
    %43 = arith.mulf %42, %41 : vector<2x128xf32>
    %cst_26 = arith.constant 1.000000e+00 : f32
    %44 = vector.broadcast %cst_26 : f32 to vector<2x128xf32>
    %45 = arith.subf %43, %44 : vector<2x128xf32>
    %46 = arith.select %33, %45, %41 : vector<2x128xi1>, vector<2x128xf32>
    %c0_27 = arith.constant 0 : index
    %c0_28 = arith.constant 0 : index
    %47 = vector.load %arg10[%c0_27, %c0_28] : memref<2x128xf32, #tpu.memory_space<vmem>>, vector<2x128xf32>
    tpu.vector_store %arg10[%c0_27, %c0_28], %46 {strides = array<i32>} : memref<2x128xf32, #tpu.memory_space<vmem>>, vector<2x128xf32>,
    return
  }
  func.func @transform_0(%arg0: i32) -> (i32, i32) {
    %c0_i32 = arith.constant 0 : i32
    %c0_i32_0 = arith.constant 0 : i32
    return %arg0, %c0_i32 : i32, i32
  }
  func.func @transform_1(%arg0: i32) -> (i32, i32) {
    %c0_i32 = arith.constant 0 : i32
    %c0_i32_0 = arith.constant 0 : i32
    %c0_i32_1 = arith.constant 0 : i32
    return %c0_i32, %c0_i32_0 : i32, i32
  }
  func.func @transform_2(%arg0: i32) -> (i32, i32) {
    %c0_i32 = arith.constant 0 : i32
    %c0_i32_0 = arith.constant 0 : i32
    %c0_i32_1 = arith.constant 0 : i32
    return %c0_i32, %c0_i32_0 : i32, i32
  }
  func.func @transform_3(%arg0: i32) -> (i32, i32) {
    %c0_i32 = arith.constant 0 : i32
    %c0_i32_0 = arith.constant 0 : i32
    %c0_i32_1 = arith.constant 0 : i32
    return %c0_i32, %c0_i32_0 : i32, i32
  }
  func.func @transform_4(%arg0: i32) -> (i32, i32) {
    %c0_i32 = arith.constant 0 : i32
    %c0_i32_0 = arith.constant 0 : i32
    %c0_i32_1 = arith.constant 0 : i32
    return %c0_i32, %c0_i32_0 : i32, i32
  }
  func.func @transform_5(%arg0: i32) -> (i32, i32) {
    %c0_i32 = arith.constant 0 : i32
    %c0_i32_0 = arith.constant 0 : i32
    %c0_i32_1 = arith.constant 0 : i32
    return %c0_i32, %c0_i32_0 : i32, i32
  }
  func.func @transform_6(%arg0: i32) -> (i32, i32) {
    %c0_i32 = arith.constant 0 : i32
    %c0_i32_0 = arith.constant 0 : i32
    %c0_i32_1 = arith.constant 0 : i32
    return %c0_i32, %c0_i32_0 : i32, i32
  }
  func.func @transform_7(%arg0: i32) -> (i32, i32) {
    %c0_i32 = arith.constant 0 : i32
    %c0_i32_0 = arith.constant 0 : i32
    %c0_i32_1 = arith.constant 0 : i32
    return %c0_i32, %c0_i32_0 : i32, i32
  }
  func.func @transform_8(%arg0: i32) -> (i32, i32) {
    %c0_i32 = arith.constant 0 : i32
    %c0_i32_0 = arith.constant 0 : i32
    %c0_i32_1 = arith.constant 0 : i32
    return %c0_i32, %c0_i32_0 : i32, i32
  }
  func.func @transform_9(%arg0: i32) -> (i32, i32) {
    %c0_i32 = arith.constant 0 : i32
    %c0_i32_0 = arith.constant 0 : i32
    return %c0_i32, %arg0 : i32, i32
  }
}

</mosaic_0001>

<bundles_post_ra>
// kernel: tpu_custom_call.1
= control target key start
LH: loop header
LB: loop body
LE: loop exit
PB: predicated region body
PF: predicated region fallthrough
CT: control target
= control target key end

     0   :  { %vm134_vm0 = vcmask 195584   ;;  %v840_v5 = vmov 0   ;;  %s1097_s0 = inlined_call_operand.vmem [shape: f32[2,24], index: 0, kind: input, shape index: {}]   ;;  %s1098_s1 = inlined_call_operand.vmem [shape: bf16[64,24], index: 1, kind: input, shape index: {}]   ;;  %s1099_s2 = inlined_call_operand.vmem [shape: f32[64,1], index: 2, kind: input, shape index: {}]   ;;  %s1100_s3 = inlined_call_operand.vmem [shape: bf16[64,64], index: 3, kind: input, shape index: {}]   ;;  %s1101_s4 = inlined_call_operand.vmem [shape: f32[64,1], index: 4, kind: input, shape index: {}]   ;;  %s1102_s5 = inlined_call_operand.vmem [shape: bf16[64,64], index: 5, kind: input, shape index: {}]   ;;  %s1103_s6 = inlined_call_operand.vmem [shape: f32[64,1], index: 6, kind: input, shape index: {}]   ;;  %s1104_s7 = inlined_call_operand.vmem [shape: bf16[2,64], index: 7, kind: input, shape index: {}]   ;;  %s1105_s8 = inlined_call_operand.vmem [shape: f32[2,1], index: 8, kind: input, shape index: {}]   ;;  %s1106_s9 = inlined_call_operand.hbm [shape: f32[2,2], index: 9, kind: output, shape index: {}]  }
   0x1   :  { %v34_v0 = vld [vmem:[%s1097_s0] sm:$0xff]  ;;  %v35_v1 = vld [vmem:[%s1097_s0 + $0x8] sm:$0xff]  ;;  %v36_v2 = vld [vmem:[%s1097_s0 + $0x10] sm:$0xff]  ;;  %798 = vset.pattern.permute.xlu0 %v840_v5  ;;  %799 = vset.pattern.permute.xlu1 %v840_v5 }
   0x2   :  { %v50_v3 = vpack.c.bf16 %v35_v1, %v34_v0  ;;  %v37_v4 = vld [vmem:[%s1097_s0 + $0x18] sm:$0xff]  ;;  %v38_v8 = vld [vmem:[%s1097_s0 + $0x20] sm:$0xff]  ;;  %v39_v9 = vld [vmem:[%s1097_s0 + $0x28] sm:$0xff] }
   0x3   :  { %v51_v6 = vpack.c.bf16 %v37_v4, %v36_v2  ;;  %v800_v10 = vld [vmem:[%s1098_s1] sm:$0xff]   ;;  %v52_v12 = vpack.c.bf16 %v39_v9, %v38_v8  ;;  %v68_v14 = vld [vmem:[%s1099_s2 + $0x10] sm:$0xff]  ;;  %v67_v15 = vld [vmem:[%s1099_s2 + $0x8] sm:$0xff] }
   0x4   :  { %786 = vmatprep.subr.msk.bf16.mxu0 %vm134_vm0, %v50_v3  ;;  %v148_v7 = vsel %vm134_vm0, %v50_v3, 0  ;;  %734 = vmatprep.mubr.msk.bf16.mxu0 %vm134_vm0, %v800_v10  ;;  %v66_v13 = vld [vmem:[%s1099_s2] sm:$0xff]  ;;  %v69_v16 = vld [vmem:[%s1099_s2 + $0x18] sm:$0xff]  ;;  %v40_v17 = vld [vmem:[%s1097_s0 + $0x30] sm:$0xff] }
   0x5   :  { %719 = vmatpush3.bf16.xpose.msra.mxu0 %v148_v7  ;;  %v151_v11 = vsel %vm134_vm0, %v51_v6, 0  ;;  %76 = vperm.xlu0 %798, %v66_v13   ;;  %v41_v18 = vld [vmem:[%s1097_s0 + $0x38] sm:$0xff]  ;;  %v70_v19 = vld [vmem:[%s1099_s2 + $0x20] sm:$0xff]  ;;  %v71_v20 = vld [vmem:[%s1099_s2 + $0x28] sm:$0xff]  ;;  %v154_v21 = vsel %vm134_vm0, %v52_v12, 0 }
   0x6   :  { %787 = vmatprep.subr.msk.bf16.mxu0 %vm134_vm0, %v51_v6  ;;  %86 = vperm.xlu1 %799, %v68_v14   ;;  %v53_v22 = vpack.c.bf16 %v41_v18, %v40_v17  ;;  %v72_v23 = vld [vmem:[%s1099_s2 + $0x30] sm:$0xff]  ;;  %v73_v24 = vld [vmem:[%s1099_s2 + $0x38] sm:$0xff]  ;;  %v42_v25 = vld [vmem:[%s1097_s0 + $0x40] sm:$0xff] }
   0x7   :  { %v43_v26 = vld [vmem:[%s1097_s0 + $0x48] sm:$0xff]  ;;  %v256_v27 = vld [vmem:[%s1101_s4] sm:$0xff] }
   0x9   :  { %81 = vperm.xlu0 %798, %v67_v15  }
   0xa   :  { %91 = vperm.xlu1 %799, %v69_v16  }
   0xd   :  { %721 = vmatpush3.bf16.xpose.msra.mxu0 %v151_v11  ;;  %96 = vperm.xlu0 %798, %v70_v19  }
   0xe   :  { %788 = vmatprep.subr.msk.bf16.mxu0 %vm134_vm0, %v52_v12  ;;  %101 = vperm.xlu1 %799, %v71_v20  }
  0x11   :  { %106 = vperm.xlu0 %798, %v72_v23  }
  0x12   :  { %111 = vperm.xlu1 %799, %v73_v24  }
  0x15   :  { %723 = vmatpush3.bf16.xpose.msra.mxu0 %v154_v21 }
  0x16   :  { %789 = vmatprep.subr.msk.bf16.mxu0 %vm134_vm0, %v53_v22 }
  0x17   :  { %14 = vsyncpa [#allocation3], 0  ;;  %v257_v28 = vld [vmem:[%s1101_s4 + $0x8] sm:$0xff]  ;;  %v157_v29 = vsel %vm134_vm0, %v53_v22, 0  ;;  %v54_v30 = vpack.c.bf16 %v43_v26, %v42_v25  ;;  %266 = vperm.xlu0 %798, %v256_v27   ;;  %v258_v31 = vld [vmem:[%s1101_s4 + $0x10] sm:$0xff]  ;;  %vm324_vm1 = vcmask 523264  }
  0x18   :  { %271 = vperm.xlu1 %799, %v257_v28   ;;  %v259_v32 = vld [vmem:[%s1101_s4 + $0x18] sm:$0xff]  ;;  %v44_v33 = vld [vmem:[%s1097_s0 + $0x50] sm:$0xff]  ;;  %v260_v35 = vld [vmem:[%s1101_s4 + $0x20] sm:$0xff]  ;;  %vm842_vm2 = vmmov 0  }
  0x19   :  { %v45_v34 = vld [vmem:[%s1097_s0 + $0x58] sm:$0xff]  ;;  %v261_v36 = vld [vmem:[%s1101_s4 + $0x28] sm:$0xff]  ;;  %v160_v37 = vsel %vm134_vm0, %v54_v30, 0  ;;  %v262_v39 = vld [vmem:[%s1101_s4 + $0x30] sm:$0xff] }
  0x1a   :  { %v55_v38 = vpack.c.bf16 %v45_v34, %v44_v33  ;;  %v263_v40 = vld [vmem:[%s1101_s4 + $0x38] sm:$0xff]  ;;  %v46_v41 = vld [vmem:[%s1097_s0 + $0x60] sm:$0xff]  ;;  %v47_v42 = vld [vmem:[%s1097_s0 + $0x68] sm:$0xff] }
  0x1b   :  { %276 = vperm.xlu0 %798, %v258_v31   ;;  %v422_v43 = vld [vmem:[%s1103_s6] sm:$0xff]  ;;  %v423_v44 = vld [vmem:[%s1103_s6 + $0x8] sm:$0xff]  ;;  %v56_v46 = vpack.c.bf16 %v47_v42, %v46_v41  ;;  %v424_v47 = vld [vmem:[%s1103_s6 + $0x10] sm:$0xff] }
  0x1c   :  { %281 = vperm.xlu1 %799, %v259_v32   ;;  %v163_v45 = vsel %vm134_vm0, %v55_v38, 0  ;;  %v425_v48 = vld [vmem:[%s1103_s6 + $0x18] sm:$0xff]  ;;  %v48_v49 = vld [vmem:[%s1097_s0 + $0x70] sm:$0xff]  ;;  %v426_v51 = vld [vmem:[%s1103_s6 + $0x20] sm:$0xff] }
  0x1d   :  { %725 = vmatpush3.bf16.xpose.msra.mxu0 %v157_v29  ;;  %v49_v50 = vld [vmem:[%s1097_s0 + $0x78] sm:$0xff]  ;;  %v427_v52 = vld [vmem:[%s1103_s6 + $0x28] sm:$0xff]  ;;  %v166_v53 = vsel %vm134_vm0, %v56_v46, 0  ;;  %v428_v55 = vld [vmem:[%s1103_s6 + $0x30] sm:$0xff] }
  0x1e   :  { %790 = vmatprep.subr.msk.bf16.mxu0 %vm134_vm0, %v54_v30  ;;  %v57_v54 = vpack.c.bf16 %v49_v50, %v48_v49  ;;  %v429_v56 = vld [vmem:[%s1103_s6 + $0x38] sm:$0xff]  ;;  %v580_v57 = vld [vmem:[%s1105_s8] sm:$0x3]  ;;  %v801_v59 = vld [vmem:[%s1098_s1 + $0x8] sm:$0xff]  }
  0x1f   :  { %286 = vperm.xlu0 %798, %v260_v35   ;;  %v802_v60 = vld [vmem:[%s1098_s1 + $0x10] sm:$0xff]   ;;  %v803_v61 = vld [vmem:[%s1098_s1 + $0x18] sm:$0xff]   ;;  %v804_v62 = vld [vmem:[%s1100_s3] sm:$0xff]  }
  0x20   :  { %291 = vperm.xlu1 %799, %v261_v36   ;;  %v169_v58 = vsel %vm134_vm0, %v57_v54, 0  ;;  %750 = vmatprep.mubr.msk.bf16.mxu1 %vm324_vm1, %v804_v62  ;;  %v805_v35 = vld [vmem:[%s1100_s3 + $0x8] sm:$0xff]   ;;  %v806_v36 = vld [vmem:[%s1100_s3 + $0x10] sm:$0xff]  }
  0x23   :  { %296 = vperm.xlu0 %798, %v262_v39  }
  0x24   :  { %301 = vperm.xlu1 %799, %v263_v40  }
  0x25   :  { %727 = vmatpush3.bf16.xpose.msra.mxu0 %v160_v37  ;;  %v807_v37 = vld [vmem:[%s1100_s3 + $0x18] sm:$0xff]  }
  0x26   :  { %791 = vmatprep.subr.msk.bf16.mxu0 %vm134_vm0, %v55_v38  ;;  %v808_v38 = vld [vmem:[%s1102_s5] sm:$0xff]  }
  0x27   :  { %432 = vperm.xlu0 %798, %v422_v43  }
  0x28   :  { %437 = vperm.xlu1 %799, %v423_v44  }
  0x2b   :  { %442 = vperm.xlu0 %798, %v424_v47  }
  0x2c   :  { %447 = vperm.xlu1 %799, %v425_v48  }
  0x2d   :  { %729 = vmatpush3.bf16.xpose.msra.mxu0 %v163_v45 }
  0x2e   :  { %792 = vmatprep.subr.msk.bf16.mxu0 %vm134_vm0, %v56_v46 }
  0x2f   :  { %452 = vperm.xlu0 %798, %v426_v51  }
  0x30   :  { %457 = vperm.xlu1 %799, %v427_v52  }
  0x33   :  { %462 = vperm.xlu0 %798, %v428_v55  }
  0x34   :  { %467 = vperm.xlu1 %799, %v429_v56  }
  0x35   :  { %731 = vmatpush3.bf16.xpose.msra.mxu0 %v166_v53 }
  0x36   :  { %793 = vmatprep.subr.msk.bf16.mxu0 %vm134_vm0, %v57_v54 }
  0x37   :  { %583 = vperm.xlu0 %798, %v580_v57  }
  0x3d   :  { %733 = vmatpush3.bf16.xpose.msra.mxu0 %v169_v58 }
  0x44   :  { %735 = vmatmul.mubr.msk.bf16.vlgmr.msra.gmra.mrb[0].mxu0 %vm134_vm0, %v801_v59 }
  0x45   :  { %738 = vmatprep.mubr.msk.bf16.mxu0 %vm134_vm0, %v802_v60 }
  0x4c   :  { %739 = vmatmul.mubr.msk.bf16.gmra.mrb[4].mxu0 %vm134_vm0, %v803_v61 }
  0x84   :  { %v77_v63 = vpop.permute.xlu0 %76 }
  0x85   :  { %v87_v0 = vpop.permute.xlu1 %86 }
  0x88   :  { %v82_v1 = vpop.permute.xlu0 %81 }
  0x89   :  { %v92_v2 = vpop.permute.xlu1 %91 }
  0x8c   :  { %v97_v6 = vpop.permute.xlu0 %96 }
  0x8d   :  { %v102_v11 = vpop.permute.xlu1 %101 }
  0x90   :  { %v107_v18 = vpop.permute.xlu0 %106 }
  0x91   :  { %v112_v23 = vpop.permute.xlu1 %111 }
  0x96   :  { %v267_v39 = vpop.permute.xlu0 %266 }
  0x97   :  { %v272_v40 = vpop.permute.xlu1 %271 }
  0x9a   :  { %v277_v41 = vpop.permute.xlu0 %276 }
  0x9b   :  { %v282_v42 = vpop.permute.xlu1 %281 }
  0x9e   :  { %v287_v46 = vpop.permute.xlu0 %286 }
  0x9f   :  { %v292_v51 = vpop.permute.xlu1 %291 }
  0xa2   :  { %v297_v58 = vpop.permute.xlu0 %296 }
 0x117   :  { %v736_v3 = vpop.f32.mrb[0].mxu0 }
 0x118   :  { %v214_v4 = vadd.f32 %v736_v3, %v87_v0  ;;  %v205_v5 = vpop.f32.mrb[1].mxu0 }
 0x119   :  { %v206_v7 = vadd.f32 %v205_v5, %v77_v63  ;;  %v737_v8 = vpop.f32.mrb[2].mxu0  ;;  %v302_v63 = vpop.permute.xlu1 %301 }
 0x11a   :  { %v217_v9 = vadd.f32 %v737_v8, %v92_v2  ;;  %v208_v10 = vpop.f32.mrb[3].mxu0  ;;  %v238_v13 = vmax.f32 %v214_v4, 0.0 }
 0x11b   :  { %v209_v12 = vadd.f32 %v208_v10, %v82_v1  ;;  %v236_v15 = vmax.f32 %v206_v7, 0.0 }
 0x11c   :  { %v239_v14 = vmax.f32 %v217_v9, 0.0 }
 0x11d   :  { %v237_v16 = vmax.f32 %v209_v12, 0.0  ;;  %v810_v12 = vld [vmem:[%s1102_s5 + $0x10] sm:$0xff]  }
 0x11e   :  { %v253_v17 = vpack.c.bf16 %v239_v14, %v238_v13  ;;  %v811_v13 = vld [vmem:[%s1102_s5 + $0x18] sm:$0xff]   ;;  %v841_v14 = vmov 0.0  }
 0x11f   :  { %v740_v19 = vpop.f32.mrb[4].mxu0  ;;  %v252_v20 = vpack.c.bf16 %v237_v16, %v236_v15  ;;  %v433_v15 = vpop.permute.xlu0 %432 }
 0x120   :  { %v230_v21 = vadd.f32 %v740_v19, %v107_v18  ;;  %v221_v22 = vpop.f32.mrb[5].mxu0  ;;  %v438_v16 = vpop.permute.xlu1 %437 }
 0x121   :  { %v222_v24 = vadd.f32 %v221_v22, %v97_v6  ;;  %v741_v25 = vpop.f32.mrb[6].mxu0  ;;  %742 = vmatprep.subr.bf16.mxu1 %v252_v20 }
 0x122   :  { %v233_v26 = vadd.f32 %v741_v25, %v112_v23  ;;  %v224_v27 = vpop.f32.mrb[7].mxu0  ;;  %743 = vmatpush3.bf16.msra.mxu1 %v252_v20  ;;  %v242_v29 = vmax.f32 %v230_v21, 0.0 }
 0x123   :  { %v225_v28 = vadd.f32 %v224_v27, %v102_v11  ;;  %744 = vmatprep.subr.bf16.mxu1 %v253_v17  ;;  %v240_v31 = vmax.f32 %v222_v24, 0.0  ;;  %v809_v11 = vld [vmem:[%s1102_s5 + $0x8] sm:$0xff]  }
 0x124   :  { %v243_v30 = vmax.f32 %v233_v26, 0.0  ;;  %v448_v18 = vpop.permute.xlu1 %447 }
 0x125   :  { %v241_v32 = vmax.f32 %v225_v28, 0.0 }
 0x126   :  { %v255_v33 = vpack.c.bf16 %v243_v30, %v242_v29  ;;  %745 = vmatpush3.bf16.msra.mxu1 %v253_v17  ;;  %v443_v17 = vpop.permute.xlu0 %442 }
 0x127   :  { %v254_v34 = vpack.c.bf16 %v241_v32, %v240_v31 }
 0x128   :  { %v458_v27 = vpop.permute.xlu1 %457 }
 0x129   :  { %746 = vmatprep.subr.bf16.mxu1 %v254_v34 }
 0x12a   :  { %747 = vmatpush3.bf16.msra.mxu1 %v254_v34  ;;  %v453_v22 = vpop.permute.xlu0 %452 }
 0x12b   :  { %748 = vmatprep.subr.bf16.mxu1 %v255_v33 }
 0x12e   :  { %749 = vmatpush3.bf16.msra.mxu1 %v255_v33  ;;  %v463_v34 = vpop.permute.xlu0 %462 }
 0x131   :  { %751 = vmatmul.mubr.msk.bf16.vlgmr.msra.gmra.mrb[0].mxu1 %vm324_vm1, %v805_v35 }
 0x132   :  { %754 = vmatprep.mubr.msk.bf16.mxu1 %vm324_vm1, %v806_v36 }
 0x139   :  { %755 = vmatmul.mubr.msk.bf16.gmra.mrb[4].mxu1 %vm324_vm1, %v807_v37 }
 0x13a   :  { %766 = vmatprep.mubr.msk.bf16.mxu1 %vm324_vm1, %v808_v38 }
 0x204   :  { %v752_v43 = vpop.f32.mrb[0].mxu1 }
 0x205   :  { %v380_v44 = vadd.f32 %v752_v43, %v277_v41  ;;  %v371_v45 = vpop.f32.mrb[1].mxu1 }
 0x206   :  { %v372_v47 = vadd.f32 %v371_v45, %v267_v39  ;;  %v753_v48 = vpop.f32.mrb[2].mxu1  ;;  %v468_v39 = vpop.permute.xlu1 %467 }
 0x207   :  { %v383_v49 = vadd.f32 %v753_v48, %v282_v42  ;;  %v374_v50 = vpop.f32.mrb[3].mxu1  ;;  %v404_v53 = vmax.f32 %v380_v44, 0.0 }
 0x208   :  { %v375_v52 = vadd.f32 %v374_v50, %v272_v40  ;;  %v402_v55 = vmax.f32 %v372_v47, 0.0 }
 0x209   :  { %v405_v54 = vmax.f32 %v383_v49, 0.0 }
 0x20a   :  { %v403_v56 = vmax.f32 %v375_v52, 0.0  ;;  %v629_v52 = vlaneseq }
 0x20b   :  { %v419_v57 = vpack.c.bf16 %v405_v54, %v404_v53  ;;  %v584_v54 = vpop.permute.xlu0 %583 }
 0x20c   :  { %v418_v59 = vpack.c.bf16 %v403_v56, %v402_v55  ;;  %v756_v60 = vpop.f32.mrb[4].mxu1  ;;  %v630_v53 = vshrl.u32 %v629_v52, 7 }
 0x20d   :  { %v396_v61 = vadd.f32 %v756_v60, %v297_v58  ;;  %v387_v62 = vpop.f32.mrb[5].mxu1 }
 0x20e   :  { %v388_v0 = vadd.f32 %v387_v62, %v287_v46  ;;  %v757_v1 = vpop.f32.mrb[6].mxu1  ;;  %758 = vmatprep.subr.bf16.mxu1 %v418_v59  ;;  %vm631_vm3 = vcmp.eq.s32.totalorder %v630_v53, 0 }
 0x20f   :  { %v399_v2 = vadd.f32 %v757_v1, %v302_v63  ;;  %v390_v3 = vpop.f32.mrb[7].mxu1  ;;  %759 = vmatpush3.bf16.msra.mxu1 %v418_v59  ;;  %v408_v5 = vmax.f32 %v396_v61, 0.0 }
 0x210   :  { %v391_v4 = vadd.f32 %v390_v3, %v292_v51  ;;  %760 = vmatprep.subr.bf16.mxu1 %v419_v57  ;;  %v406_v7 = vmax.f32 %v388_v0, 0.0  ;;  %v575_v51 = vld [vmem:[%s1104_s7] sm:$0x1]  ;;  %s843_s7 = smov [#allocation2]  }
 0x211   :  { %v409_v6 = vmax.f32 %v399_v2, 0.0  ;;  %s650_s22 = sshll.u32 %s843_s7, 4  ;;  %s651_s22 = int_to_ptr.vmem [resolvable:$true] %s650_s22 }
 0x212   :  { %v407_v8 = vmax.f32 %v391_v4, 0.0  ;;  %s816_s0 = scalar_lea.vmem %s651_s22, 32  ;;  %p821_p1 = scmp.lt.s32.totalorder %s651_s22, %s651_s22 }
 0x213   :  { %v421_v9 = vpack.c.bf16 %v409_v6, %v408_v5  ;;  %761 = vmatpush3.bf16.msra.mxu1 %v419_v57  ;;  %p817_p0 = scmp.ne.s32.totalorder %s651_s22, %s816_s0  ;;  %p822_p2 = scmp.lt.s32.totalorder %s816_s0, %s816_s0 }
 0x214   :  { %v420_v10 = vpack.c.bf16 %v407_v8, %v406_v7 }
 0x215   :  { %p823_p3 = por %p822_p2, %p821_p1 }
 0x216   :  { %762 = vmatprep.subr.bf16.mxu1 %v420_v10 }
 0x217   :  { %763 = vmatpush3.bf16.msra.mxu1 %v420_v10  ;;  %p824_p4 = pnand %p823_p3, %p817_p0 }
 0x218   :  { %764 = vmatprep.subr.bf16.mxu1 %v421_v9 }
 0x21b   :  { %765 = vmatpush3.bf16.msra.mxu1 %v421_v9 }
 0x21c   :  { %774 = vmatprep.subr.bf16.mxu1 %v841_v14 }
 0x21e   :  { %767 = vmatmul.mubr.msk.bf16.vlgmr.msra.gmra.mrb[8].mxu1 %vm324_vm1, %v809_v11 }
 0x21f   :  { %770 = vmatprep.mubr.msk.bf16.mxu1 %vm324_vm1, %v810_v12 }
 0x226   :  { %771 = vmatmul.mubr.msk.bf16.gmra.mrb[12].mxu1 %vm324_vm1, %v811_v13 }
 0x227   :  { %782 = vmatprep.mubr.msk.bf16.mxu1 %vm842_vm2, %v841_v14 }
 0x2f1   :  { %v768_v19 = vpop.f32.mrb[8].mxu1 }
 0x2f2   :  { %v545_v20 = vadd.f32 %v768_v19, %v443_v17  ;;  %v536_v21 = vpop.f32.mrb[9].mxu1 }
 0x2f3   :  { %v537_v23 = vadd.f32 %v536_v21, %v433_v15  ;;  %v769_v24 = vpop.f32.mrb[10].mxu1 }
 0x2f4   :  { %v548_v25 = vadd.f32 %v769_v24, %v448_v18  ;;  %v539_v26 = vpop.f32.mrb[11].mxu1  ;;  %v569_v29 = vmax.f32 %v545_v20, 0.0 }
 0x2f5   :  { %v540_v28 = vadd.f32 %v539_v26, %v438_v16  ;;  %v567_v31 = vmax.f32 %v537_v23, 0.0 }
 0x2f6   :  { %v570_v30 = vmax.f32 %v548_v25, 0.0 }
 0x2f7   :  { %v568_v32 = vmax.f32 %v540_v28, 0.0 }
 0x2f8   :  { %v577_v33 = vpack.c.bf16 %v570_v30, %v569_v29 }
 0x2f9   :  { %v576_v35 = vpack.c.bf16 %v568_v32, %v567_v31  ;;  %v772_v36 = vpop.f32.mrb[12].mxu1 }
 0x2fa   :  { %v561_v37 = vadd.f32 %v772_v36, %v463_v34  ;;  %v552_v38 = vpop.f32.mrb[13].mxu1 }
 0x2fb   :  { %v553_v40 = vadd.f32 %v552_v38, %v453_v22  ;;  %v773_v41 = vpop.f32.mrb[14].mxu1  ;;  %775 = vmatpush3.bf16.msra.mxu1 %v576_v35 }
 0x2fc   :  { %v564_v42 = vadd.f32 %v773_v41, %v468_v39  ;;  %v555_v43 = vpop.f32.mrb[15].mxu1  ;;  %776 = vmatprep.subr.bf16.mxu1 %v841_v14  ;;  %v573_v45 = vmax.f32 %v561_v37, 0.0 }
 0x2fd   :  { %v556_v44 = vadd.f32 %v555_v43, %v458_v27  ;;  %v571_v47 = vmax.f32 %v553_v40, 0.0 }
 0x2fe   :  { %v574_v46 = vmax.f32 %v564_v42, 0.0 }
 0x2ff   :  { %v572_v48 = vmax.f32 %v556_v44, 0.0  ;;  %777 = vmatpush3.bf16.msra.mxu1 %v577_v33 }
 0x300   :  { %v579_v49 = vpack.c.bf16 %v574_v46, %v573_v45  ;;  %778 = vmatprep.subr.bf16.mxu1 %v841_v14 }
 0x301   :  { %v578_v50 = vpack.c.bf16 %v572_v48, %v571_v47 }
 0x303   :  { %779 = vmatpush3.bf16.msra.mxu1 %v578_v50 }
 0x304   :  { %780 = vmatprep.subr.bf16.mxu1 %v841_v14 }
 0x307   :  { %781 = vmatpush3.bf16.msra.mxu1 %v579_v49 }
 0x30a   :  { %783 = vmatmul.mubr.msk.bf16.vlgmr.msra.gmra.mrb[16].mxu1 %vm324_vm1, %v575_v51 }
 0x3dd   :  { %v623_v55 = vpop.f32.mrb[16].mxu1 }
 0x3de   :  { %v624_v56 = vadd.f32 %v623_v55, %v584_v54  ;;  %v784_v57 = vpop.f32.mrb[17].mxu1 }
 0x3df   :  { %v626_v58 = vpop.f32.mrb[18].mxu1 }
 0x3e0   :  { %v632_v59 = vmul.f32 2.0, %v624_v56  ;;  %v785_v60 = vpop.f32.mrb[19].mxu1 }
 0x3e2   :  { %v633_v61 = vsel %vm631_vm3, %v632_v59, %v624_v56 }
 0x3e3   :  { %v683_v62 = vmul.f32 -1.442695, %v633_v61 }
 0x3e5   :  { %812 = vpow2.f32 %v683_v62 }
 0x3ef   :  { %v813_v63 = vpop.eup %812 }
 0x3f0   :  { %v637_v0 = vadd.f32 1.0, %v813_v63 }
 0x3f2   :  { %814 = vrcp.f32 %v637_v0 }
 0x3fc   :  { %v815_v1 = vpop.eup %814 }
 0x3fd   :  { %v640_v2 = vmul.f32 2.0, %v815_v1 }
 0x3ff   :  { %v684_v3 = vadd.f32 -1.0, %v640_v2 }
 0x401   :  { %v642_v4 = vsel %vm631_vm3, %v684_v3, %v815_v1 }
 0x402   :  { %643 = vst [vmem:[#allocation2] sm:$0x3] %v642_v4 }
 0x403   :  { %827 = shalt.err (!%p824_p4)
}
 0x404   :  { %s828_s25 = scalar_lea.hbm %s1106_s9, 32 }
 0x405   :  { %p829_p5 = scmp.ne.s32.totalorder %s1106_s9, %s828_s25  ;;  %p832_p6 = scmp.lt.u32.totalorder %s828_s25, %s1106_s9 }
 0x407   :  { %p834_p7 = pnand %p832_p6, %p829_p5 }
 0x409   :  { %837 = shalt.err (!%p834_p7)
}
 0x40a   :  { %653 = dma.vmem_to_hbm [thread:$0]  %s651_s22, 32, %s1106_s9, [#allocation3]  }
 0x40b   :  { %838 = dma.done.wait [#allocation3], 32  }
 0x40c   :  { %839 = vsyncadd [#allocation3], 4294967264 }
 0x40d   :  { %657 = vsyncpa [#allocation3], 1 }

</bundles_post_ra>
